<compile_context>
chip_gen: v6e
topology: v6e:2x2x1
jax: 0.10.0
libtpu: 0.0.40
codegen_flags: <defaults>
</compile_context>

<pallas_src>
import functools

import jax
import jax.numpy as jnp
from jax import lax
from jax.experimental import pallas as pl
from jax.experimental.pallas import tpu as pltpu

N_FEATURES = 10
HIDDEN = 32
OUT = 1


def _mlp_kernel(x_ref, w1_ref, b1_ref, w2_ref, b2_ref, o_ref):
    # x_ref : (block_b, F)   batch-major tile of the input
    # w1_ref: (H, F)         layer-1 weight (PyTorch layout)
    # b1_ref: (H, 1)         layer-1 bias as a column
    # w2_ref: (H, 1)         layer-2 weight as a column
    # b2_ref: (1, 1)  SMEM   layer-2 bias (scalar)
    # o_ref : (1, block_b)   lane-dense output row (batch on lanes)
    x = x_ref[...]

    # Layer 1: H^T = W1 @ X^T  (contract the feature dims of both operands).
    # Batch lands on the lane axis, so everything downstream is lane-dense.
    h = lax.dot_general(
        w1_ref[...], x,
        dimension_numbers=(((1,), (1,)), ((), ())),
        preferred_element_type=jnp.float32,
    )                                                     # (H, block_b) f32
    h = jnp.maximum(h + b1_ref[...], 0.0)                 # bias + ReLU (VPU, f32)

    # Layer 2 (32 -> 1) on the VPU + sublane reduce; avoids a 1-column MXU matmul.
    y = jnp.sum(h * w2_ref[...], axis=0, keepdims=True)   # (1, block_b)
    y = y + b2_ref[0, 0]
    o_ref[...] = y.astype(o_ref.dtype)


@functools.partial(jax.jit, static_argnames=("block_b",))
def neural_network_forward(x, w1, b1, w2, b2, *, block_b=2048):
    """Forward pass of the 10 -> 32 -> ReLU -> 1 MLP.

    x : (B, n_features); w1: (32, n_features); b1: (32,); w2: (1, 32); b2: (1,)
    Returns (B, 1) with x's dtype. Weights are in PyTorch nn.Linear layout.
    """
    B, F = x.shape
    H = w1.shape[0]

    # --- batch tile sizing --------------------------------------------------
    if B <= block_b:
        block_b = B                                   # single full block (always legal)
    else:
        block_b = max(128, (block_b // 128) * 128)    # lane-aligned tile
        # keep >= 4 grid steps so both v7x TensorCores stay busy
        while block_b > 128 and pl.cdiv(B, block_b) < 4:
            block_b //= 2
    grid = (pl.cdiv(B, block_b),)

    # --- tiny trace-time parameter plumbing ---------------------------------
    b1c = b1.reshape(H, 1)
    w2c = w2.reshape(H, 1)                            # (1, H) -> (H, 1) column
    b2c = b2.reshape(1, 1)

    flops = 2 * B * (F * H + H * OUT)
    bytes_accessed = (x.size * x.dtype.itemsize
                      + B * OUT * x.dtype.itemsize
                      + (w1.size + b1.size + w2.size + b2.size) * w1.dtype.itemsize)

    out_row = pl.pallas_call(
        _mlp_kernel,
        out_shape=jax.ShapeDtypeStruct((1, B), x.dtype),
        grid=grid,
        in_specs=[
            pl.BlockSpec((block_b, F), lambda i: (i, 0)),       # x tile over batch
            pl.BlockSpec((H, F), lambda i: (0, 0)),             # w1 (resident)
            pl.BlockSpec((H, 1), lambda i: (0, 0)),             # b1 column
            pl.BlockSpec((H, 1), lambda i: (0, 0)),             # w2 column
            pl.BlockSpec(memory_space=pltpu.MemorySpace.SMEM),  # b2 scalar in SMEM
        ],
        out_specs=pl.BlockSpec((1, block_b), lambda i: (0, i)), # lane-dense output
        compiler_params=pltpu.CompilerParams(
            dimension_semantics=("parallel",),
        ),
        cost_estimate=pl.CostEstimate(
            flops=flops, transcendentals=0, bytes_accessed=bytes_accessed),
    )(x, w1, b1c, w2c, b2c)

    # (1, B) -> (B, 1): pure layout plumbing (row-major order unchanged).
    return out_row.reshape(B, OUT)


def init_params(key, n_features=N_FEATURES, hidden=HIDDEN, out=OUT):
    """PyTorch nn.Linear-style init (uniform +-1/sqrt(fan_in)), PyTorch layouts."""
    k1, k2, k3, k4 = jax.random.split(key, 4)
    bound1 = 1.0 / jnp.sqrt(jnp.float32(n_features))
    bound2 = 1.0 / jnp.sqrt(jnp.float32(hidden))
    w1 = jax.random.uniform(k1, (hidden, n_features), jnp.float32, -bound1, bound1)
    b1 = jax.random.uniform(k2, (hidden,), jnp.float32, -bound1, bound1)
    w2 = jax.random.uniform(k3, (out, hidden), jnp.float32, -bound2, bound2)
    b2 = jax.random.uniform(k4, (out,), jnp.float32, -bound2, bound2)
    return w1, b1, w2, b2


def _reference(x, w1, b1, w2, b2):
    h = jnp.maximum(x @ w1.T + b1, 0.0)
    return h @ w2.T + b2


if __name__ == "__main__":
    key = jax.random.PRNGKey(0)
    kx, kp, kx2 = jax.random.split(key, 3)
    w1, b1, w2, b2 = init_params(kp)

    # Small demo batch (single full block).
    B = 8
    x = jax.random.normal(kx, (B, N_FEATURES), jnp.float32)
    out = jax.block_until_ready(neural_network_forward(x, w1, b1, w2, b2))
    ref = _reference(x, w1, b1, w2, b2)
    assert out.shape == (B, OUT)
    assert jnp.allclose(out, ref, atol=1e-5, rtol=1e-5)

    # Multi-block path (grid of 4 batch tiles) — still small and fast.
    B2 = 512
    x2 = jax.random.normal(kx2, (B2, N_FEATURES), jnp.float32)
    out2 = jax.block_until_ready(
        neural_network_forward(x2, w1, b1, w2, b2, block_b=128))
    ref2 = _reference(x2, w1, b1, w2, b2)
    assert out2.shape == (B2, OUT)
    assert jnp.allclose(out2, ref2, atol=1e-5, rtol=1e-5)

    print("KERNEL_OK")
</pallas_src>

<mosaic_0001>
module attributes {stable_mosaic.version = 11 : i64} {
  func.func @_mlp_kernel(%arg0: i32, %arg1: memref<8x10xf32, #tpu.memory_space<vmem>>, %arg2: memref<32x10xf32, #tpu.memory_space<vmem>>, %arg3: memref<32x1xf32, #tpu.memory_space<vmem>>, %arg4: memref<32x1xf32, #tpu.memory_space<vmem>>, %arg5: memref<1x1xf32, #tpu.memory_space<smem>>, %arg6: memref<1x8xf32, #tpu.memory_space<vmem>>) attributes {dimension_semantics = [#tpu.dimension_semantics<parallel>], iteration_bounds = array<i64: 1>, scalar_prefetch = 0 : i64, scratch_operands = 0 : i64, tpu.core_type = #tpu.core_type<tc>, window_params = [{transform_indices = @transform_0, window_bounds = array<i64: 8, 10>}, {pipeline_mode = #tpu.pipeline_mode<synchronous>, transform_indices = @transform_1, window_bounds = array<i64: 32, 10>}, {pipeline_mode = #tpu.pipeline_mode<synchronous>, transform_indices = @transform_2, window_bounds = array<i64: 32, 1>}, {pipeline_mode = #tpu.pipeline_mode<synchronous>, transform_indices = @transform_3, window_bounds = array<i64: 32, 1>}, {transform_indices = @transform_4, window_bounds = array<i64: 1, 1>}, {transform_indices = @transform_5, window_bounds = array<i64: 1, 8>}]} {
    %c0 = arith.constant 0 : index
    %c0_0 = arith.constant 0 : index
    %0 = vector.load %arg1[%c0, %c0_0] : memref<8x10xf32, #tpu.memory_space<vmem>>, vector<8x10xf32>
    %c0_1 = arith.constant 0 : index
    %c0_2 = arith.constant 0 : index
    %1 = vector.load %arg2[%c0_1, %c0_2] : memref<32x10xf32, #tpu.memory_space<vmem>>, vector<32x10xf32>
    %cst = arith.constant dense<0.000000e+00> : vector<32x8xf32>
    %2 = tpu.matmul %1, %0, %cst {dimension_numbers = #tpu.dot_dimension_numbers<[1], [1], [0], [0], [0, 0, 1, 0], [], []>} : vector<32x10xf32>, vector<8x10xf32>, vector<32x8xf32> -> vector<32x8xf32>
    %c0_3 = arith.constant 0 : index
    %c0_4 = arith.constant 0 : index
    %3 = vector.load %arg3[%c0_3, %c0_4] : memref<32x1xf32, #tpu.memory_space<vmem>>, vector<32x1xf32>
    %4 = vector.broadcast %3 : vector<32x1xf32> to vector<32x8xf32>
    %5 = arith.addf %2, %4 : vector<32x8xf32>
    %cst_5 = arith.constant 0.000000e+00 : f32
    %6 = vector.broadcast %cst_5 : f32 to vector<32x8xf32>
    %7 = arith.maximumf %5, %6 : vector<32x8xf32>
    %c0_6 = arith.constant 0 : index
    %c0_7 = arith.constant 0 : index
    %8 = vector.load %arg4[%c0_6, %c0_7] : memref<32x1xf32, #tpu.memory_space<vmem>>, vector<32x1xf32>
    %9 = vector.broadcast %8 : vector<32x1xf32> to vector<32x8xf32>
    %10 = arith.mulf %7, %9 : vector<32x8xf32>
    %cst_8 = arith.constant dense<0.000000e+00> : vector<8xf32>
    %11 = vector.multi_reduction <add>, %10, %cst_8 [0] : vector<32x8xf32> to vector<8xf32>
    %12 = vector.shape_cast %11 : vector<8xf32> to vector<1x8xf32>
    %c0_9 = arith.constant 0 : index
    %c0_10 = arith.constant 0 : index
    %13 = memref.load %arg5[%c0_9, %c0_10] : memref<1x1xf32, #tpu.memory_space<smem>>
    %14 = vector.broadcast %13 : f32 to vector<1x8xf32>
    %15 = arith.addf %12, %14 : vector<1x8xf32>
    %c0_11 = arith.constant 0 : index
    %c0_12 = arith.constant 0 : index
    %16 = vector.load %arg6[%c0_11, %c0_12] : memref<1x8xf32, #tpu.memory_space<vmem>>, vector<1x8xf32>
    tpu.vector_store %arg6[%c0_11, %c0_12], %15 {strides = array<i32>} : memref<1x8xf32, #tpu.memory_space<vmem>>, vector<1x8xf32>,
    return
  }
  func.func @transform_0(%arg0: i32) -> (i32, i32) {
    %c0_i32 = arith.constant 0 : i32
    %c0_i32_0 = arith.constant 0 : i32
    return %arg0, %c0_i32 : i32, i32
  }
  func.func @transform_1(%arg0: i32) -> (i32, i32) {
    %c0_i32 = arith.constant 0 : i32
    %c0_i32_0 = arith.constant 0 : i32
    %c0_i32_1 = arith.constant 0 : i32
    return %c0_i32, %c0_i32_0 : i32, i32
  }
  func.func @transform_2(%arg0: i32) -> (i32, i32) {
    %c0_i32 = arith.constant 0 : i32
    %c0_i32_0 = arith.constant 0 : i32
    %c0_i32_1 = arith.constant 0 : i32
    return %c0_i32, %c0_i32_0 : i32, i32
  }
  func.func @transform_3(%arg0: i32) -> (i32, i32) {
    %c0_i32 = arith.constant 0 : i32
    %c0_i32_0 = arith.constant 0 : i32
    %c0_i32_1 = arith.constant 0 : i32
    return %c0_i32, %c0_i32_0 : i32, i32
  }
  func.func @transform_4(%arg0: i32) -> (i32, i32) {
    %c0_i32 = arith.constant 0 : i32
    %c0_i32_0 = arith.constant 0 : i32
    %c0_i32_1 = arith.constant 0 : i32
    return %c0_i32, %c0_i32_0 : i32, i32
  }
  func.func @transform_5(%arg0: i32) -> (i32, i32) {
    %c0_i32 = arith.constant 0 : i32
    %c0_i32_0 = arith.constant 0 : i32
    return %c0_i32, %arg0 : i32, i32
  }
}

</mosaic_0001>

<bundles_post_ra>
// kernel: neural_network_forward.1
= control target key start
LH: loop header
LB: loop body
LE: loop exit
PB: predicated region body
PF: predicated region fallthrough
CT: control target
= control target key end

     0   :  { %vm51_vm0 = vcmask 80896   ;;  %v263_v7 = vmov 0   ;;  %s348_s0 = inlined_call_operand.vmem [shape: f32[8,10], index: 0, kind: input, shape index: {}]   ;;  %s349_s1 = inlined_call_operand.vmem [shape: f32[32,10], index: 1, kind: input, shape index: {}]   ;;  %s350_s2 = inlined_call_operand.vmem [shape: f32[32,1], index: 2, kind: input, shape index: {}]   ;;  %s351_s3 = inlined_call_operand.vmem [shape: f32[32,1], index: 3, kind: input, shape index: {}]   ;;  %s352_s4 = inlined_call_operand.<no memory space> [shape: f32[1,1], index: 4, kind: input, shape index: {}]   ;;  %s353_s5 = inlined_call_operand.hbm [shape: f32[1,8], index: 5, kind: output, shape index: {}]  }
   0x1   :  { %v22_v0 = vld [vmem:[%s348_s0] sm:$0xff]  ;;  %v25_v2 = vld [vmem:[%s349_s1 + $0x10] sm:$0xff]  ;;  %v24_v3 = vld [vmem:[%s349_s1 + $0x8] sm:$0xff]  ;;  %239 = vset.pattern.permute.xlu0 %v263_v7  ;;  %240 = vset.pattern.permute.xlu1 %v263_v7 }
   0x2   :  { %v23_v1 = vld [vmem:[%s349_s1] sm:$0xff]  ;;  %227 = vmatprep.subr.msk.mxu0 %vm51_vm0, %v22_v0  ;;  %235 = vmatprep.subr.msk.mxu1 %vm51_vm0, %v22_v0  ;;  %v26_v4 = vld [vmem:[%s349_s1 + $0x18] sm:$0xff]  ;;  %v29_v6 = vld [vmem:[%s350_s2 + $0x10] sm:$0xff] }
   0x3   :  { %228 = vmatpush3.xpose.msk.msra.mxu0 %vm51_vm0, %v22_v0  ;;  %236 = vmatpush3.xpose.msk.msra.mxu1 %vm51_vm0, %v22_v0  ;;  %v27_v5 = vld [vmem:[%s350_s2] sm:$0xff] }
   0x4   :  { %229 = vmatprep.mubr.msk.f32.mxu0 %vm51_vm0, %v23_v1  ;;  %232 = vmatprep.mubr.msk.f32.mxu1 %vm51_vm0, %v25_v2 }
   0x5   :  { %11 = vsyncpa [#allocation4], 0  ;;  %33 = vperm.xlu0 %239, %v27_v5   ;;  %43 = vperm.xlu1 %240, %v29_v6   ;;  %v28_v8 = vld [vmem:[%s350_s2 + $0x8] sm:$0xff]  ;;  %v30_v9 = vld [vmem:[%s350_s2 + $0x18] sm:$0xff]  ;;  %vm184_vm1 = vcmask 64512   ;;  %v199_v50 = vstv %s352_s4  ;;  %s264_s17 = smov [#allocation3]  }
   0x6   :  { %230 = vmatmul.mubr.msk.f32.vlgmr.msra.gmra.mxu0 %vm51_vm0, %v24_v3  ;;  %233 = vmatmul.mubr.msk.f32.vlgmr.msra.gmra.mxu1 %vm51_vm0, %v26_v4  ;;  %v156_v10 = vld [vmem:[%s351_s3] sm:$0xff]  ;;  %v157_v11 = vld [vmem:[%s351_s3 + $0x8] sm:$0xff]  ;;  %v158_v12 = vld [vmem:[%s351_s3 + $0x10] sm:$0xff]  ;;  %s209_s18 = sshll.u32 %s264_s17, 4  ;;  %vm201_vm2 = vcmask 57344   ;;  %s210_s18 = int_to_ptr.vmem [resolvable:$true] %s209_s18 }
   0x7   :  { %v159_v13 = vld [vmem:[%s351_s3 + $0x18] sm:$0xff]  ;;  %s241_s19 = scalar_lea.vmem %s210_s18, 16  ;;  %s245_s20 = scalar_lea.vmem %s210_s18, 32 }
   0x8   :  { %p242_p0 = scmp.ne.s32.totalorder %s210_s18, %s241_s19  ;;  %p246_p1 = scmp.lt.s32.totalorder %s210_s18, %s210_s18 }
   0x9   :  { %38 = vperm.xlu0 %239, %v28_v8   ;;  %48 = vperm.xlu1 %240, %v30_v9   ;;  %p247_p2 = scmp.lt.s32.totalorder %s245_s20, %s241_s19 }
   0xb   :  { %p248_p3 = por %p247_p2, %p246_p1 }
   0xd   :  { %162 = vperm.xlu0 %239, %v156_v10   ;;  %167 = vperm.xlu1 %240, %v157_v11   ;;  %p249_p4 = pnand %p248_p3, %p242_p0 }
  0x11   :  { %172 = vperm.xlu0 %239, %v158_v12   ;;  %177 = vperm.xlu1 %240, %v159_v13  }
  0x80   :  { %v34_v14 = vpop.permute.xlu0 %33  ;;  %v44_v15 = vpop.permute.xlu1 %43 }
  0x84   :  { %v39_v16 = vpop.permute.xlu0 %38  ;;  %v49_v17 = vpop.permute.xlu1 %48 }
  0x88   :  { %v163_v18 = vpop.permute.xlu0 %162  ;;  %v168_v21 = vpop.permute.xlu1 %167 }
  0x8c   :  { %v173_v33 = vpop.permute.xlu0 %172  ;;  %v178_v36 = vpop.permute.xlu1 %177 }
  0xc6   :  { %v231_v19 = vpop.f32.mrf.mxu0  ;;  %v234_v20 = vpop.f32.mrf.mxu1 }
  0xc7   :  { %v139_v22 = vadd.f32 %v231_v19, %v39_v16  ;;  %v149_v23 = vadd.f32 %v234_v20, %v49_v17 }
  0xc8   :  { %v133_v24 = vpop.f32.mrf.mxu0  ;;  %v143_v25 = vpop.f32.mrf.mxu1 }
  0xc9   :  { %v153_v26 = vmax.f32 %v139_v22, 0.0  ;;  %v134_v27 = vadd.f32 %v133_v24, %v34_v14  ;;  %v144_v28 = vadd.f32 %v143_v25, %v44_v15  ;;  %v155_v30 = vmax.f32 %v149_v23, 0.0 }
  0xcb   :  { %v181_v29 = vmul.f32 %v168_v21, %v153_v26  ;;  %v152_v31 = vmax.f32 %v134_v27, 0.0  ;;  %v154_v32 = vmax.f32 %v144_v28, 0.0  ;;  %v183_v38 = vmul.f32 %v178_v36, %v155_v30 }
  0xcd   :  { %v180_v34 = vmul.f32 %v163_v18, %v152_v31  ;;  %v182_v35 = vmul.f32 %v173_v33, %v154_v32  ;;  %v186_v37 = vsel %vm184_vm1, %v181_v29, 0.0  ;;  %v190_v43 = vsel %vm184_vm1, %v183_v38, 0.0 }
  0xcf   :  { %v185_v39 = vsel %vm184_vm1, %v180_v34, 0.0  ;;  %v188_v41 = vsel %vm184_vm1, %v182_v35, 0.0 }
  0xd0   :  { %v187_v40 = vadd.f32 %v186_v37, %v185_v39 }
  0xd2   :  { %v189_v42 = vadd.f32 %v188_v41, %v187_v40 }
  0xd4   :  { %v191_v44 = vadd.f32 %v190_v43, %v189_v42 }
  0xd6   :  { %v192_v45 = vrot.slane %v191_v44, 4 }
  0xd8   :  { %v193_v46 = vadd.f32 %v192_v45, %v191_v44 }
  0xda   :  { %v194_v47 = vrot.slane %v193_v46, 2 }
  0xdc   :  { %v195_v48 = vadd.f32 %v194_v47, %v193_v46 }
  0xde   :  { %v196_v49 = vrot.slane %v195_v48, 1 }
  0xe0   :  { %v197_v51 = vadd.f32 %v196_v49, %v195_v48 }
  0xe2   :  { %v200_v52 = vadd.f32 %v199_v50, %v197_v51 }
  0xe4   :  { %202 = vst.msk [vmem:[#allocation3] sm:$0x1] %vm201_vm2, %v200_v52 }
  0xe5   :  { %252 = shalt.err (!%p249_p4)
}
  0xe6   :  { %212 = dma.vmem_to_hbm [thread:$0]  %s210_s18, 16, %s353_s5, [#allocation4]  }
  0xe7   :  { %261 = dma.done.wait [#allocation4], 16  }
  0xe8   :  { %262 = vsyncadd [#allocation4], 4294967280 }
  0xe9   :  { %216 = vsyncpa [#allocation4], 1 }

</bundles_post_ra>
